<compile_context>
chip_gen: v6e
topology: v6e:2x2x1
jax: 0.10.0
libtpu: 0.0.40
codegen_flags: <defaults>
</compile_context>

<pallas_src>
import math
from functools import partial

import jax
import jax.numpy as jnp
from jax.experimental import pallas as pl
from jax.experimental.pallas import tpu as pltpu

_MAX_TM = 1024           # rows per tile; working set stays at a few hundred KiB
_PALLAS_MIN_ROWS = 1024  # below this, a single fused XLA dot wins on dispatch


def _cdiv(a, b):
    return -(-a // b)


def _round_up(x, m):
    return ((x + m - 1) // m) * m


def _choose_tm(M):
    """Balanced row tiling: tm multiple of 16, or tm == M for a single tile."""
    num_tiles = _cdiv(M, _MAX_TM)
    if num_tiles == 1 and M >= 32:
        num_tiles = 2          # give v7x's second TensorCore half the rows
    if num_tiles == 1:
        return M               # full-extent block is always a legal block shape
    return _round_up(_cdiv(M, num_tiles), 16)


_COMPILER_PARAMS = pltpu.CompilerParams(
    dimension_semantics=("parallel",),   # independent row tiles -> megacore split
)


# ---------------------------------------------------------------------------
# Kernels
# ---------------------------------------------------------------------------
def _linear_kernel(x_ref, w_ref, b_ref, o_ref):
    # x: (tm, K) f32  w: (K, N) bf16  b: (1, N) f32  o: (tm, N) f32
    x = x_ref[...].astype(jnp.bfloat16)          # cheap VPU cast, hidden under DMA
    acc = jnp.dot(x, w_ref[...], preferred_element_type=jnp.float32)
    o_ref[...] = (acc + b_ref[...]).astype(o_ref.dtype)


def _dual_linear_kernel(x_ref, wp_ref, wv_ref, bp_ref, bv_ref, o_ref, *, bs, tm):
    # rot_vel: global rows < bs are frame 0 (pose projection), rest are velocity.
    i = pl.program_id(0)
    x = x_ref[...].astype(jnp.bfloat16)
    acc_v = jnp.dot(x, wv_ref[...], preferred_element_type=jnp.float32) + bv_ref[...]
    o_ref[...] = acc_v.astype(o_ref.dtype)

    # Only tiles that actually contain frame-0 rows pay the second MXU dot
    # and the select (for bs <= tm this is just the first tile).
    @pl.when(i * tm < bs)
    def _():
        acc_p = (jnp.dot(x, wp_ref[...], preferred_element_type=jnp.float32)
                 + bp_ref[...])
        row = jax.lax.broadcasted_iota(jnp.int32, (tm, 1), 0) + i * tm
        o_ref[...] = jnp.where(row < bs, acc_p, acc_v).astype(o_ref.dtype)


# ---------------------------------------------------------------------------
# Wrappers (single pallas_call each, no wrapper-side pad/cast/slice)
# ---------------------------------------------------------------------------
def pallas_linear(x2d, w, b):
    """y = x2d @ w + b. x2d f32 (M, K), w bf16 (K, N), b f32 (1, N)."""
    M, K = x2d.shape
    N = w.shape[1]
    tm = _choose_tm(M)
    grid = (_cdiv(M, tm),)

    cost = pl.CostEstimate(
        flops=2 * M * K * N,
        transcendentals=0,
        bytes_accessed=M * K * 4 + K * N * 2 + N * 4 + M * N * 4,
    )

    return pl.pallas_call(
        _linear_kernel,
        out_shape=jax.ShapeDtypeStruct((M, N), x2d.dtype),
        grid=grid,
        in_specs=[
            pl.BlockSpec((tm, K), lambda i: (i, 0)),
            pl.BlockSpec((K, N), lambda i: (0, 0)),
            pl.BlockSpec((1, N), lambda i: (0, 0)),
        ],
        out_specs=pl.BlockSpec((tm, N), lambda i: (i, 0)),
        compiler_params=_COMPILER_PARAMS,
        cost_estimate=cost,
    )(x2d, w, b)


def pallas_dual_linear(x2d, w_pose, b_pose, w_vel, b_vel, bs):
    """rot_vel path in ONE call: rows < bs -> pose Linear, rest -> vel Linear."""
    M, K = x2d.shape
    N = w_pose.shape[1]
    tm = _choose_tm(M)
    grid = (_cdiv(M, tm),)

    cost = pl.CostEstimate(
        flops=2 * M * K * N + 2 * min(tm, M) * K * N,   # vel everywhere + pose tile
        transcendentals=0,
        bytes_accessed=M * K * 4 + 2 * K * N * 2 + 2 * N * 4 + M * N * 4,
    )

    return pl.pallas_call(
        partial(_dual_linear_kernel, bs=bs, tm=tm),
        out_shape=jax.ShapeDtypeStruct((M, N), x2d.dtype),
        grid=grid,
        in_specs=[
            pl.BlockSpec((tm, K), lambda i: (i, 0)),
            pl.BlockSpec((K, N), lambda i: (0, 0)),
            pl.BlockSpec((K, N), lambda i: (0, 0)),
            pl.BlockSpec((1, N), lambda i: (0, 0)),
            pl.BlockSpec((1, N), lambda i: (0, 0)),
        ],
        out_specs=pl.BlockSpec((tm, N), lambda i: (i, 0)),
        compiler_params=_COMPILER_PARAMS,
        cost_estimate=cost,
    )(x2d, w_pose, w_vel, b_pose, b_vel)


# ---------------------------------------------------------------------------
# OutputProcess forward (matches the PyTorch module semantics)
# ---------------------------------------------------------------------------
def output_process_forward(output, params, *, data_rep, njoints, nfeats,
                           force_pallas=False):
    """output: (nframes, bs, latent_dim) -> (bs, njoints, nfeats, nframes)."""
    nframes, bs, d = output.shape
    M = nframes * bs
    x2d = output.reshape(M, d)  # row index = frame * bs + batch
    use_pallas = force_pallas or M >= _PALLAS_MIN_ROWS

    if data_rep in ("rot6d", "xyz", "hml_vec"):
        if use_pallas:
            y = pallas_linear(x2d, params["pose_w"], params["pose_b"])
        else:
            y = x2d @ params["pose_w_f32"] + params["pose_b_f32"]
    elif data_rep == "rot_vel":
        if use_pallas:
            y = pallas_dual_linear(
                x2d,
                params["pose_w"], params["pose_b"],
                params["vel_w"], params["vel_b"],
                bs,
            )
        else:
            y_pose = x2d[:bs] @ params["pose_w_f32"] + params["pose_b_f32"]
            y_vel = x2d[bs:] @ params["vel_w_f32"] + params["vel_b_f32"]
            y = jnp.concatenate([y_pose, y_vel], axis=0)
    else:
        raise ValueError(f"unsupported data_rep: {data_rep}")

    y = y.reshape(nframes, bs, njoints, nfeats)
    # permute(1, 2, 3, 0): nframes << 128 lanes, leave the materializing copy to XLA.
    return jnp.transpose(y, (1, 2, 3, 0))


# ---------------------------------------------------------------------------
# Parameter init (mimics nn.Linear default init) + one-time kernel prep
# ---------------------------------------------------------------------------
def init_params(key, latent_dim, input_feats, data_rep):
    def linear_params(k):
        kw, kb = jax.random.split(k)
        bound = 1.0 / math.sqrt(latent_dim)
        # stored transposed relative to torch: (in, out)
        w = jax.random.uniform(kw, (latent_dim, input_feats), jnp.float32,
                               -bound, bound)
        b = jax.random.uniform(kb, (1, input_feats), jnp.float32, -bound, bound)
        return w, b

    k_pose, k_vel = jax.random.split(key)
    pose_w, pose_b = linear_params(k_pose)
    params = {"pose_w": pose_w, "pose_b": pose_b}
    if data_rep == "rot_vel":
        vel_w, vel_b = linear_params(k_vel)
        params.update({"vel_w": vel_w, "vel_b": vel_b})
    return params


def prepare_params(raw):
    """Hoisted, once-per-model prep: bf16 kernel weights + f32 biases (1, N)."""
    prepped = {
        "pose_w": raw["pose_w"].astype(jnp.bfloat16),
        "pose_b": raw["pose_b"].reshape(1, -1).astype(jnp.float32),
        "pose_w_f32": raw["pose_w"].astype(jnp.float32),
        "pose_b_f32": raw["pose_b"].reshape(1, -1).astype(jnp.float32),
    }
    if "vel_w" in raw:
        prepped.update({
            "vel_w": raw["vel_w"].astype(jnp.bfloat16),
            "vel_b": raw["vel_b"].reshape(1, -1).astype(jnp.float32),
            "vel_w_f32": raw["vel_w"].astype(jnp.float32),
            "vel_b_f32": raw["vel_b"].reshape(1, -1).astype(jnp.float32),
        })
    return prepped


# ---------------------------------------------------------------------------
# Main
# ---------------------------------------------------------------------------
if __name__ == "__main__":
    njoints, nfeats = 4, 6
    input_feats = njoints * nfeats  # 24
    latent_dim = 32

    key = jax.random.PRNGKey(0)
    k_x, k_x2, k_p1, k_p2 = jax.random.split(key, 4)

    def ref_forward(x, raw, data_rep):
        nframes, bs, d = x.shape
        x2d = x.reshape(nframes * bs, d)
        if data_rep == "rot_vel":
            y = jnp.concatenate(
                [x2d[:bs] @ raw["pose_w"] + raw["pose_b"],
                 x2d[bs:] @ raw["vel_w"] + raw["vel_b"]], axis=0)
        else:
            y = x2d @ raw["pose_w"] + raw["pose_b"]
        return jnp.transpose(y.reshape(nframes, bs, njoints, nfeats), (1, 2, 3, 0))

    # --- small shapes: nframes=8, bs=2 (single tile) --------------------------
    nframes, bs = 8, 2
    x = jax.random.normal(k_x, (nframes, bs, latent_dim), jnp.float32)

    raw1 = init_params(k_p1, latent_dim, input_feats, "rot6d")
    params1 = prepare_params(raw1)
    out = output_process_forward(x, params1, data_rep="rot6d",
                                 njoints=njoints, nfeats=nfeats,
                                 force_pallas=True)
    out = jax.block_until_ready(out)
    assert out.shape == (bs, njoints, nfeats, nframes), out.shape
    ref = ref_forward(x, raw1, "rot6d")
    # bf16 MXU inputs with f32 accumulation -> relaxed tolerance vs f32 ref.
    assert jnp.allclose(out, ref, atol=5e-2, rtol=5e-2)

    # small-problem fallback path (pure XLA dot) should agree too
    out_fb = jax.block_until_ready(
        output_process_forward(x, params1, data_rep="rot6d",
                               njoints=njoints, nfeats=nfeats))
    assert jnp.allclose(out_fb, ref, atol=1e-5, rtol=1e-5)

    raw2 = init_params(k_p2, latent_dim, input_feats, "rot_vel")
    params2 = prepare_params(raw2)
    out_rv = output_process_forward(x, params2, data_rep="rot_vel",
                                    njoints=njoints, nfeats=nfeats,
                                    force_pallas=True)
    out_rv = jax.block_until_ready(out_rv)
    assert out_rv.shape == (bs, njoints, nfeats, nframes), out_rv.shape
    ref_rv = ref_forward(x, raw2, "rot_vel")
    assert jnp.allclose(out_rv, ref_rv, atol=5e-2, rtol=5e-2)

    # --- medium shapes: exercises multi-tile grid, partial last block,
    #     and the pl.when-gated pose branch --------------------------------
    nframes2, bs2 = 60, 3          # M = 180 -> 2 tiles of tm=96, last partial
    x2 = jax.random.normal(k_x2, (nframes2, bs2, latent_dim), jnp.float32)
    out_rv2 = output_process_forward(x2, params2, data_rep="rot_vel",
                                     njoints=njoints, nfeats=nfeats,
                                     force_pallas=True)
    out_rv2 = jax.block_until_ready(out_rv2)
    assert out_rv2.shape == (bs2, njoints, nfeats, nframes2), out_rv2.shape
    ref_rv2 = ref_forward(x2, raw2, "rot_vel")
    assert jnp.allclose(out_rv2, ref_rv2, atol=5e-2, rtol=5e-2)

    print("KERNEL_OK")
</pallas_src>

<mosaic_0001>
module attributes {stable_mosaic.version = 11 : i64} {
  func.func @_linear_kernel(%arg0: i32, %arg1: memref<16x32xf32, #tpu.memory_space<vmem>>, %arg2: memref<32x24xbf16, #tpu.memory_space<vmem>>, %arg3: memref<1x24xf32, #tpu.memory_space<vmem>>, %arg4: memref<16x24xf32, #tpu.memory_space<vmem>>) attributes {dimension_semantics = [#tpu.dimension_semantics<parallel>], iteration_bounds = array<i64: 1>, scalar_prefetch = 0 : i64, scratch_operands = 0 : i64, tpu.core_type = #tpu.core_type<tc>, window_params = [{transform_indices = @transform_0, window_bounds = array<i64: 16, 32>}, {pipeline_mode = #tpu.pipeline_mode<synchronous>, transform_indices = @transform_1, window_bounds = array<i64: 32, 24>}, {pipeline_mode = #tpu.pipeline_mode<synchronous>, transform_indices = @transform_2, window_bounds = array<i64: 1, 24>}, {transform_indices = @transform_3, window_bounds = array<i64: 16, 24>}]} {
    %c0 = arith.constant 0 : index
    %c0_0 = arith.constant 0 : index
    %0 = vector.load %arg1[%c0, %c0_0] : memref<16x32xf32, #tpu.memory_space<vmem>>, vector<16x32xf32>
    %1 = arith.truncf %0 : vector<16x32xf32> to vector<16x32xbf16>
    %c0_1 = arith.constant 0 : index
    %c0_2 = arith.constant 0 : index
    %2 = vector.load %arg2[%c0_1, %c0_2] : memref<32x24xbf16, #tpu.memory_space<vmem>>, vector<32x24xbf16>
    %cst = arith.constant dense<0.000000e+00> : vector<16x24xf32>
    %3 = tpu.matmul %1, %2, %cst {dimension_numbers = #tpu.dot_dimension_numbers<[1], [0], [0], [1], [0, 0, 1, 1], [], []>} : vector<16x32xbf16>, vector<32x24xbf16>, vector<16x24xf32> -> vector<16x24xf32>
    %c0_3 = arith.constant 0 : index
    %c0_4 = arith.constant 0 : index
    %4 = vector.load %arg3[%c0_3, %c0_4] : memref<1x24xf32, #tpu.memory_space<vmem>>, vector<1x24xf32>
    %5 = vector.broadcast %4 : vector<1x24xf32> to vector<16x24xf32>
    %6 = arith.addf %3, %5 : vector<16x24xf32>
    %c0_5 = arith.constant 0 : index
    %c0_6 = arith.constant 0 : index
    %7 = vector.load %arg4[%c0_5, %c0_6] : memref<16x24xf32, #tpu.memory_space<vmem>>, vector<16x24xf32>
    tpu.vector_store %arg4[%c0_5, %c0_6], %6 {strides = array<i32>} : memref<16x24xf32, #tpu.memory_space<vmem>>, vector<16x24xf32>,
    return
  }
  func.func @transform_0(%arg0: i32) -> (i32, i32) {
    %c0_i32 = arith.constant 0 : i32
    %c0_i32_0 = arith.constant 0 : i32
    return %arg0, %c0_i32 : i32, i32
  }
  func.func @transform_1(%arg0: i32) -> (i32, i32) {
    %c0_i32 = arith.constant 0 : i32
    %c0_i32_0 = arith.constant 0 : i32
    %c0_i32_1 = arith.constant 0 : i32
    return %c0_i32, %c0_i32_0 : i32, i32
  }
  func.func @transform_2(%arg0: i32) -> (i32, i32) {
    %c0_i32 = arith.constant 0 : i32
    %c0_i32_0 = arith.constant 0 : i32
    %c0_i32_1 = arith.constant 0 : i32
    return %c0_i32, %c0_i32_0 : i32, i32
  }
  func.func @transform_3(%arg0: i32) -> (i32, i32) {
    %c0_i32 = arith.constant 0 : i32
    %c0_i32_0 = arith.constant 0 : i32
    return %arg0, %c0_i32 : i32, i32
  }
}

</mosaic_0001>

<bundles_post_ra>
// kernel: tpu_custom_call.1
= control target key start
LH: loop header
LB: loop body
LE: loop exit
PB: predicated region body
PF: predicated region fallthrough
CT: control target
= control target key end

     0   :  { %v150_v1 = vmov 0.0   ;;  %vm151_vm0 = vmmov 0   ;;  %s193_s0 = inlined_call_operand.vmem [shape: f32[16,32], index: 0, kind: input, shape index: {}]   ;;  %s194_s1 = inlined_call_operand.vmem [shape: bf16[32,24], index: 1, kind: input, shape index: {}]   ;;  %s195_s2 = inlined_call_operand.vmem [shape: f32[1,24], index: 2, kind: input, shape index: {}]   ;;  %s196_s3 = inlined_call_operand.hbm [shape: f32[16,24], index: 3, kind: output, shape index: {}]  }
   0x1   :  { %v126_v0 = vld [vmem:[%s194_s1 + $0x8] sm:$0xff]   ;;  %113 = vmatprep.subr.bf16.mxu0 %v150_v1  ;;  %v127_v2 = vld [vmem:[%s194_s1] sm:$0xff]   ;;  %117 = vmatprep.mubr.msk.bf16.mxu0 %vm151_vm0, %v150_v1 }
   0x2   :  { %114 = vmatpush3.bf16.msra.mxu0 %v126_v0  ;;  %v16_v3 = vld [vmem:[%s193_s0] sm:$0xff]  ;;  %v17_v4 = vld [vmem:[%s193_s0 + $0x8] sm:$0xff] }
   0x3   :  { %115 = vmatprep.subr.bf16.mxu0 %v150_v1 }
   0x4   :  { %8 = vsyncpa [#allocation3], 0  ;;  %v18_v5 = vpack.c.bf16 %v17_v4, %v16_v3  ;;  %vm42_vm1 = vcmask 261120   ;;  %v106_v6 = vld [vmem:[%s195_s2] ss:$0 sm:$0xff]  ;;  %vm87_vm2 = vcmask 195584  }
   0x5   :  { %s152_s1 = smov [#allocation2]  }
   0x6   :  { %116 = vmatpush3.bf16.msra.mxu0 %v127_v2  ;;  %s95_s22 = sshll.u32 %s152_s1, 4  ;;  %s96_s22 = int_to_ptr.vmem [resolvable:$true] %s95_s22 }
   0x7   :  { %s128_s0 = scalar_lea.vmem %s96_s22, 256  ;;  %p133_p1 = scmp.lt.s32.totalorder %s96_s22, %s96_s22 }
   0x8   :  { %p129_p0 = scmp.ne.s32.totalorder %s96_s22, %s128_s0  ;;  %p134_p2 = scmp.lt.s32.totalorder %s128_s0, %s128_s0 }
   0x9   :  { %118 = vmatmul.mubr.msk.bf16.vlgmr.msra.gmra.mxu0 %vm42_vm1, %v18_v5 }
   0xa   :  { %p135_p3 = por %p134_p2, %p133_p1 }
   0xc   :  { %p136_p4 = pnand %p135_p3, %p129_p0 }
  0xc9   :  { %v80_v7 = vpop.f32.mrf.mxu0 }
  0xca   :  { %v81_v8 = vadd.f32 %v106_v6, %v80_v7 }
  0xcb   :  { %v119_v9 = vpop.f32.mrf.mxu0 }
  0xcc   :  { %88 = vst.msk [vmem:[#allocation2] sm:$0xff] %vm87_vm2, %v81_v8 }
  0xcd   :  { %v83_v10 = vpop.f32.mrf.mxu0 }
  0xce   :  { %v84_v11 = vadd.f32 %v106_v6, %v83_v10 }
  0xcf   :  { %v120_v12 = vpop.f32.mrf.mxu0 }
  0xd0   :  { %89 = vst.msk [vmem:[#allocation2 + $0x8] sm:$0xff] %vm87_vm2, %v84_v11 }
  0xd1   :  { %139 = shalt.err (!%p136_p4)
}
  0xd2   :  { %s153_s2 = smov 128   ;;  %s154_s23 = smov 8  }
  0xd3   :  { %101 = dma.vmem_to_hbm [thread:$0]  %s96_s22, 256, %s196_s3, [#allocation3], %s153_s2, %s153_s2, %s154_s23  }
  0xd4   :  { %148 = dma.done.wait [#allocation3], 256  }
  0xd5   :  { %149 = vsyncadd [#allocation3], 4294967040 }
  0xd6   :  { %105 = vsyncpa [#allocation3], 1 }

</bundles_post_ra>
